<compile_context>
chip_gen: v7x
topology: tpu7x:2x2x1
jax: 0.10.0
libtpu: 0.0.40
codegen_flags: <defaults>
</compile_context>

<pallas_src>
import math
import functools
from itertools import permutations

import numpy as np
import jax
import jax.numpy as jnp
from jax import lax
from jax.experimental import pallas as pl
from jax.experimental.pallas import tpu as pltpu

PI = math.pi
INV_PI = 1.0 / math.pi
LANE = 128
CHUNK = 8            # sublanes per register-resident chunk (one f32 vreg slab)
MAX_SUBLANES = 512   # per grid step: 512 * 128 = 65536 batch elements


def _round_up(x, m):
    return ((x + m - 1) // m) * m


def _tree_min(vals):
    while len(vals) > 1:
        nxt = [jnp.minimum(vals[k], vals[k + 1]) for k in range(0, len(vals) - 1, 2)]
        if len(vals) % 2:
            nxt.append(vals[-1])
        vals = nxt
    return vals[0]


def _prmse_kernel(pred_ref, tgt_ref, out_ref, *, num_sources, num_chunks, chunk):
    # pred_ref / tgt_ref: (M, S, 128) f32 blocks — batch on (sublane, lane).
    # out_ref: (1, chunk, 128) f32 per-grid-step partial sums of sqrt(min_sumsq).
    M = num_sources
    full = (1 << M) - 1
    # Subsets of pred indices grouped by popcount; level j assigns target j.
    levels = [[m for m in range(1, 1 << M) if bin(m).count("1") == j + 1]
              for j in range(M)]

    def chunk_body(c, acc):
        off = pl.multiple_of(c * chunk, chunk)
        # Dense (chunk, 128) slabs, one per predicted source.
        p_rows = [pred_ref[i, pl.ds(off, chunk), :] for i in range(M)]

        # Subset-DP over the assignment problem; sq column j computed lazily.
        best = {0: None}
        for j in range(M):
            t_j = tgt_ref[j, pl.ds(off, chunk), :]
            sqcol = []
            for i in range(M):
                d = p_rows[i] - t_j
                # wrap to [-pi/2, pi/2]: d - pi * round(d / pi)  (floor-based
                # round; boundary sign flip is erased by the square).
                k = jnp.floor(d * INV_PI + 0.5)
                e = d - PI * k
                sqcol.append(e * e)
            new_best = {}
            for mask in levels[j]:
                cands = []
                for i in range(M):
                    if mask & (1 << i):
                        prev = best[mask ^ (1 << i)]
                        cands.append(sqcol[i] if prev is None else prev + sqcol[i])
                new_best[mask] = _tree_min(cands)
            best = new_best

        min_sumsq = best[full]                         # (chunk, 128)
        return acc + jnp.sqrt(min_sumsq)               # sqrt after the min

    acc0 = jnp.zeros((chunk, LANE), jnp.float32)
    # Modest unroll keeps ILP without blowing the 64-entry vreg file.
    unroll = min(num_chunks, 4 if M <= 3 else (2 if M == 4 else 1))
    acc = lax.fori_loop(0, num_chunks, chunk_body, acc0, unroll=unroll)
    out_ref[0, :, :] = acc


@jax.jit
def prmse_loss(preds, doa):
    """preds, doa: (B, M) float32 arrays of angles (radians). Returns scalar."""
    preds = jnp.asarray(preds, jnp.float32)
    doa = jnp.asarray(doa, jnp.float32)
    B, M = preds.shape
    if M > 8:
        # TODO(synk): subset-DP state count is 2^M; fall back to host for M > 8.
        raise ValueError("PRMSE Pallas kernel supports up to 8 sources.")

    rows = max(1, -(-B // LANE))                       # ceil(B / 128)
    S = min(MAX_SUBLANES, _round_up(rows, CHUNK))      # sublanes per grid step
    R_pad = _round_up(rows, S)
    G = R_pad // S
    B_pad = R_pad * LANE
    num_chunks = S // CHUNK

    # (B, M) -> (M, R_pad, 128); padded entries are 0 -> wrapped error is 0.
    pt = jnp.zeros((M, B_pad), jnp.float32).at[:, :B].set(preds.T)
    dt = jnp.zeros((M, B_pad), jnp.float32).at[:, :B].set(doa.T)
    pt = pt.reshape(M, R_pad, LANE)
    dt = dt.reshape(M, R_pad, LANE)

    kernel = functools.partial(_prmse_kernel, num_sources=M,
                               num_chunks=num_chunks, chunk=CHUNK)

    partials = pl.pallas_call(
        kernel,
        out_shape=jax.ShapeDtypeStruct((G, CHUNK, LANE), jnp.float32),
        grid=(G,),
        in_specs=[
            pl.BlockSpec((M, S, LANE), lambda i: (0, i, 0)),
            pl.BlockSpec((M, S, LANE), lambda i: (0, i, 0)),
        ],
        out_specs=pl.BlockSpec((1, CHUNK, LANE), lambda i: (i, 0, 0)),
        compiler_params=pltpu.CompilerParams(
            dimension_semantics=("parallel",),         # independent per-step outputs
            vmem_limit_bytes=32 * 1024 * 1024,         # safe on v7x's 64 MiB VMEM too
        ),
    )(pt, dt)

    # Apply 1/sqrt(M) once to the final scalar; tiny (G,8,128) reduction in XLA.
    return jnp.sum(partials) * jnp.float32(1.0 / math.sqrt(M))


def _reference(preds, doa):
    # Vectorized numpy reference mirroring the PyTorch loop semantics.
    preds = np.asarray(preds, np.float64)
    doa = np.asarray(doa, np.float64)
    B, M = preds.shape
    perms = np.asarray(list(permutations(range(M))), dtype=np.int64)   # (P, M)
    permuted = preds[:, perms]                                         # (B, P, M)
    err = np.mod(permuted - doa[:, None, :] + np.pi / 2, np.pi) - np.pi / 2
    rmse = np.sqrt((err ** 2).sum(-1)) / np.sqrt(M)                    # (B, P)
    return float(rmse.min(axis=1).sum())


if __name__ == "__main__":
    key = jax.random.PRNGKey(0)
    k1, k2, k3, k4 = jax.random.split(key, 4)

    # Small case matching the module (B=4 frames, M=3 DOA angles -> 6 perms).
    B1, M1 = 4, 3
    p1 = jax.random.uniform(k1, (B1, M1), jnp.float32, minval=-np.pi, maxval=np.pi)
    d1 = jax.random.uniform(k2, (B1, M1), jnp.float32, minval=-np.pi, maxval=np.pi)
    o1 = jax.block_until_ready(prmse_loss(p1, d1))
    r1 = _reference(np.asarray(p1), np.asarray(d1))
    assert np.allclose(np.asarray(o1), r1, rtol=1e-4, atol=1e-4), (float(o1), r1)

    # Second case exercising the multi-chunk inner loop and M=4 subset DP.
    B2, M2 = 1200, 4
    p2 = jax.random.uniform(k3, (B2, M2), jnp.float32, minval=-np.pi, maxval=np.pi)
    d2 = jax.random.uniform(k4, (B2, M2), jnp.float32, minval=-np.pi, maxval=np.pi)
    o2 = jax.block_until_ready(prmse_loss(p2, d2))
    r2 = _reference(np.asarray(p2), np.asarray(d2))
    assert np.allclose(np.asarray(o2), r2, rtol=1e-4, atol=1e-3), (float(o2), r2)

    print("KERNEL_OK")
</pallas_src>

<mosaic_0001>
module attributes {stable_mosaic.version = 11 : i64} {
  func.func @_prmse_kernel(%arg0: i32, %arg1: memref<3x8x128xf32, #tpu.memory_space<vmem>>, %arg2: memref<3x8x128xf32, #tpu.memory_space<vmem>>, %arg3: memref<1x8x128xf32, #tpu.memory_space<vmem>>) attributes {dimension_semantics = [#tpu.dimension_semantics<parallel>], iteration_bounds = array<i64: 1>, scalar_prefetch = 0 : i64, scratch_operands = 0 : i64, tpu.core_type = #tpu.core_type<tc>, window_params = [{transform_indices = @transform_0, window_bounds = array<i64: 3, 8, 128>}, {transform_indices = @transform_1, window_bounds = array<i64: 3, 8, 128>}, {transform_indices = @transform_2, window_bounds = array<i64: 1, 8, 128>}]} {
    %cst = arith.constant 0.000000e+00 : f32
    %0 = vector.broadcast %cst : f32 to vector<8x128xf32>
    %c0_i32 = arith.constant 0 : i32
    %c8_i32 = arith.constant 8 : i32
    %1 = arith.muli %c0_i32, %c8_i32 : i32
    %2 = tpu.assume_multiple %1, 8 : i32
    %c0 = arith.constant 0 : index
    %3 = arith.index_cast %2 : i32 to index
    %c0_0 = arith.constant 0 : index
    %4 = vector.load %arg1[%c0, %3, %c0_0] : memref<3x8x128xf32, #tpu.memory_space<vmem>>, vector<1x8x128xf32>
    %5 = vector.shape_cast %4 : vector<1x8x128xf32> to vector<8x128xf32>
    %c1 = arith.constant 1 : index
    %6 = arith.index_cast %2 : i32 to index
    %c0_1 = arith.constant 0 : index
    %7 = vector.load %arg1[%c1, %6, %c0_1] : memref<3x8x128xf32, #tpu.memory_space<vmem>>, vector<1x8x128xf32>
    %8 = vector.shape_cast %7 : vector<1x8x128xf32> to vector<8x128xf32>
    %c2 = arith.constant 2 : index
    %9 = arith.index_cast %2 : i32 to index
    %c0_2 = arith.constant 0 : index
    %10 = vector.load %arg1[%c2, %9, %c0_2] : memref<3x8x128xf32, #tpu.memory_space<vmem>>, vector<1x8x128xf32>
    %11 = vector.shape_cast %10 : vector<1x8x128xf32> to vector<8x128xf32>
    %c0_3 = arith.constant 0 : index
    %12 = arith.index_cast %2 : i32 to index
    %c0_4 = arith.constant 0 : index
    %13 = vector.load %arg2[%c0_3, %12, %c0_4] : memref<3x8x128xf32, #tpu.memory_space<vmem>>, vector<1x8x128xf32>
    %14 = vector.shape_cast %13 : vector<1x8x128xf32> to vector<8x128xf32>
    %15 = arith.subf %5, %14 : vector<8x128xf32>
    %cst_5 = arith.constant 0.318309873 : f32
    %16 = vector.broadcast %cst_5 : f32 to vector<8x128xf32>
    %17 = arith.mulf %15, %16 : vector<8x128xf32>
    %cst_6 = arith.constant 5.000000e-01 : f32
    %18 = vector.broadcast %cst_6 : f32 to vector<8x128xf32>
    %19 = arith.addf %17, %18 : vector<8x128xf32>
    %20 = math.floor %19 : vector<8x128xf32>
    %cst_7 = arith.constant 3.14159274 : f32
    %21 = vector.broadcast %cst_7 : f32 to vector<8x128xf32>
    %22 = arith.mulf %21, %20 : vector<8x128xf32>
    %23 = arith.subf %15, %22 : vector<8x128xf32>
    %24 = arith.mulf %23, %23 : vector<8x128xf32>
    %25 = arith.subf %8, %14 : vector<8x128xf32>
    %cst_8 = arith.constant 0.318309873 : f32
    %26 = vector.broadcast %cst_8 : f32 to vector<8x128xf32>
    %27 = arith.mulf %25, %26 : vector<8x128xf32>
    %cst_9 = arith.constant 5.000000e-01 : f32
    %28 = vector.broadcast %cst_9 : f32 to vector<8x128xf32>
    %29 = arith.addf %27, %28 : vector<8x128xf32>
    %30 = math.floor %29 : vector<8x128xf32>
    %cst_10 = arith.constant 3.14159274 : f32
    %31 = vector.broadcast %cst_10 : f32 to vector<8x128xf32>
    %32 = arith.mulf %31, %30 : vector<8x128xf32>
    %33 = arith.subf %25, %32 : vector<8x128xf32>
    %34 = arith.mulf %33, %33 : vector<8x128xf32>
    %35 = arith.subf %11, %14 : vector<8x128xf32>
    %cst_11 = arith.constant 0.318309873 : f32
    %36 = vector.broadcast %cst_11 : f32 to vector<8x128xf32>
    %37 = arith.mulf %35, %36 : vector<8x128xf32>
    %cst_12 = arith.constant 5.000000e-01 : f32
    %38 = vector.broadcast %cst_12 : f32 to vector<8x128xf32>
    %39 = arith.addf %37, %38 : vector<8x128xf32>
    %40 = math.floor %39 : vector<8x128xf32>
    %cst_13 = arith.constant 3.14159274 : f32
    %41 = vector.broadcast %cst_13 : f32 to vector<8x128xf32>
    %42 = arith.mulf %41, %40 : vector<8x128xf32>
    %43 = arith.subf %35, %42 : vector<8x128xf32>
    %44 = arith.mulf %43, %43 : vector<8x128xf32>
    %c1_14 = arith.constant 1 : index
    %45 = arith.index_cast %2 : i32 to index
    %c0_15 = arith.constant 0 : index
    %46 = vector.load %arg2[%c1_14, %45, %c0_15] : memref<3x8x128xf32, #tpu.memory_space<vmem>>, vector<1x8x128xf32>
    %47 = vector.shape_cast %46 : vector<1x8x128xf32> to vector<8x128xf32>
    %48 = arith.subf %5, %47 : vector<8x128xf32>
    %cst_16 = arith.constant 0.318309873 : f32
    %49 = vector.broadcast %cst_16 : f32 to vector<8x128xf32>
    %50 = arith.mulf %48, %49 : vector<8x128xf32>
    %cst_17 = arith.constant 5.000000e-01 : f32
    %51 = vector.broadcast %cst_17 : f32 to vector<8x128xf32>
    %52 = arith.addf %50, %51 : vector<8x128xf32>
    %53 = math.floor %52 : vector<8x128xf32>
    %cst_18 = arith.constant 3.14159274 : f32
    %54 = vector.broadcast %cst_18 : f32 to vector<8x128xf32>
    %55 = arith.mulf %54, %53 : vector<8x128xf32>
    %56 = arith.subf %48, %55 : vector<8x128xf32>
    %57 = arith.mulf %56, %56 : vector<8x128xf32>
    %58 = arith.subf %8, %47 : vector<8x128xf32>
    %cst_19 = arith.constant 0.318309873 : f32
    %59 = vector.broadcast %cst_19 : f32 to vector<8x128xf32>
    %60 = arith.mulf %58, %59 : vector<8x128xf32>
    %cst_20 = arith.constant 5.000000e-01 : f32
    %61 = vector.broadcast %cst_20 : f32 to vector<8x128xf32>
    %62 = arith.addf %60, %61 : vector<8x128xf32>
    %63 = math.floor %62 : vector<8x128xf32>
    %cst_21 = arith.constant 3.14159274 : f32
    %64 = vector.broadcast %cst_21 : f32 to vector<8x128xf32>
    %65 = arith.mulf %64, %63 : vector<8x128xf32>
    %66 = arith.subf %58, %65 : vector<8x128xf32>
    %67 = arith.mulf %66, %66 : vector<8x128xf32>
    %68 = arith.subf %11, %47 : vector<8x128xf32>
    %cst_22 = arith.constant 0.318309873 : f32
    %69 = vector.broadcast %cst_22 : f32 to vector<8x128xf32>
    %70 = arith.mulf %68, %69 : vector<8x128xf32>
    %cst_23 = arith.constant 5.000000e-01 : f32
    %71 = vector.broadcast %cst_23 : f32 to vector<8x128xf32>
    %72 = arith.addf %70, %71 : vector<8x128xf32>
    %73 = math.floor %72 : vector<8x128xf32>
    %cst_24 = arith.constant 3.14159274 : f32
    %74 = vector.broadcast %cst_24 : f32 to vector<8x128xf32>
    %75 = arith.mulf %74, %73 : vector<8x128xf32>
    %76 = arith.subf %68, %75 : vector<8x128xf32>
    %77 = arith.mulf %76, %76 : vector<8x128xf32>
    %78 = arith.addf %34, %57 : vector<8x128xf32>
    %79 = arith.addf %24, %67 : vector<8x128xf32>
    %80 = arith.minimumf %78, %79 : vector<8x128xf32>
    %81 = arith.addf %44, %57 : vector<8x128xf32>
    %82 = arith.addf %24, %77 : vector<8x128xf32>
    %83 = arith.minimumf %81, %82 : vector<8x128xf32>
    %84 = arith.addf %44, %67 : vector<8x128xf32>
    %85 = arith.addf %34, %77 : vector<8x128xf32>
    %86 = arith.minimumf %84, %85 : vector<8x128xf32>
    %c2_25 = arith.constant 2 : index
    %87 = arith.index_cast %2 : i32 to index
    %c0_26 = arith.constant 0 : index
    %88 = vector.load %arg2[%c2_25, %87, %c0_26] : memref<3x8x128xf32, #tpu.memory_space<vmem>>, vector<1x8x128xf32>
    %89 = vector.shape_cast %88 : vector<1x8x128xf32> to vector<8x128xf32>
    %90 = arith.subf %5, %89 : vector<8x128xf32>
    %cst_27 = arith.constant 0.318309873 : f32
    %91 = vector.broadcast %cst_27 : f32 to vector<8x128xf32>
    %92 = arith.mulf %90, %91 : vector<8x128xf32>
    %cst_28 = arith.constant 5.000000e-01 : f32
    %93 = vector.broadcast %cst_28 : f32 to vector<8x128xf32>
    %94 = arith.addf %92, %93 : vector<8x128xf32>
    %95 = math.floor %94 : vector<8x128xf32>
    %cst_29 = arith.constant 3.14159274 : f32
    %96 = vector.broadcast %cst_29 : f32 to vector<8x128xf32>
    %97 = arith.mulf %96, %95 : vector<8x128xf32>
    %98 = arith.subf %90, %97 : vector<8x128xf32>
    %99 = arith.mulf %98, %98 : vector<8x128xf32>
    %100 = arith.subf %8, %89 : vector<8x128xf32>
    %cst_30 = arith.constant 0.318309873 : f32
    %101 = vector.broadcast %cst_30 : f32 to vector<8x128xf32>
    %102 = arith.mulf %100, %101 : vector<8x128xf32>
    %cst_31 = arith.constant 5.000000e-01 : f32
    %103 = vector.broadcast %cst_31 : f32 to vector<8x128xf32>
    %104 = arith.addf %102, %103 : vector<8x128xf32>
    %105 = math.floor %104 : vector<8x128xf32>
    %cst_32 = arith.constant 3.14159274 : f32
    %106 = vector.broadcast %cst_32 : f32 to vector<8x128xf32>
    %107 = arith.mulf %106, %105 : vector<8x128xf32>
    %108 = arith.subf %100, %107 : vector<8x128xf32>
    %109 = arith.mulf %108, %108 : vector<8x128xf32>
    %110 = arith.subf %11, %89 : vector<8x128xf32>
    %cst_33 = arith.constant 0.318309873 : f32
    %111 = vector.broadcast %cst_33 : f32 to vector<8x128xf32>
    %112 = arith.mulf %110, %111 : vector<8x128xf32>
    %cst_34 = arith.constant 5.000000e-01 : f32
    %113 = vector.broadcast %cst_34 : f32 to vector<8x128xf32>
    %114 = arith.addf %112, %113 : vector<8x128xf32>
    %115 = math.floor %114 : vector<8x128xf32>
    %cst_35 = arith.constant 3.14159274 : f32
    %116 = vector.broadcast %cst_35 : f32 to vector<8x128xf32>
    %117 = arith.mulf %116, %115 : vector<8x128xf32>
    %118 = arith.subf %110, %117 : vector<8x128xf32>
    %119 = arith.mulf %118, %118 : vector<8x128xf32>
    %120 = arith.addf %86, %99 : vector<8x128xf32>
    %121 = arith.addf %83, %109 : vector<8x128xf32>
    %122 = arith.addf %80, %119 : vector<8x128xf32>
    %123 = arith.minimumf %120, %121 : vector<8x128xf32>
    %124 = arith.minimumf %123, %122 : vector<8x128xf32>
    %125 = math.sqrt %124 : vector<8x128xf32>
    %126 = arith.addf %0, %125 : vector<8x128xf32>
    %c1_i32 = arith.constant 1 : i32
    %c0_36 = arith.constant 0 : index
    %c0_37 = arith.constant 0 : index
    %c0_38 = arith.constant 0 : index
    %127 = vector.load %arg3[%c0_36, %c0_37, %c0_38] : memref<1x8x128xf32, #tpu.memory_space<vmem>>, vector<1x8x128xf32>
    %128 = vector.shape_cast %127 : vector<1x8x128xf32> to vector<8x128xf32>
    %129 = vector.shape_cast %126 : vector<8x128xf32> to vector<1x8x128xf32>
    tpu.vector_store %arg3[%c0_36, %c0_37, %c0_38], %129 {strides = array<i32>} : memref<1x8x128xf32, #tpu.memory_space<vmem>>, vector<1x8x128xf32>,
    return
  }
  func.func @transform_0(%arg0: i32) -> (i32, i32, i32) {
    %c0_i32 = arith.constant 0 : i32
    %c0_i32_0 = arith.constant 0 : i32
    %c0_i32_1 = arith.constant 0 : i32
    return %c0_i32, %arg0, %c0_i32_0 : i32, i32, i32
  }
  func.func @transform_1(%arg0: i32) -> (i32, i32, i32) {
    %c0_i32 = arith.constant 0 : i32
    %c0_i32_0 = arith.constant 0 : i32
    %c0_i32_1 = arith.constant 0 : i32
    return %c0_i32, %arg0, %c0_i32_0 : i32, i32, i32
  }
  func.func @transform_2(%arg0: i32) -> (i32, i32, i32) {
    %c0_i32 = arith.constant 0 : i32
    %c0_i32_0 = arith.constant 0 : i32
    %c0_i32_1 = arith.constant 0 : i32
    return %arg0, %c0_i32, %c0_i32_0 : i32, i32, i32
  }
}

</mosaic_0001>

<bundles_post_ra>
// kernel: prmse_loss.1
= control target key start
LH: loop header
LB: loop body
LE: loop exit
PB: predicated region body
PF: predicated region fallthrough
CT: control target
= control target key end

     0   :  { %s159_s0 = inlined_call_operand.vmem [shape: f32[3,8,128], index: 0, kind: input, shape index: {}]   ;;  %s160_s1 = inlined_call_operand.vmem [shape: f32[3,8,128], index: 1, kind: input, shape index: {}]   ;;  %s161_s2 = inlined_call_operand.vmem [shape: f32[1,8,128], index: 2, kind: output, shape index: {}]  }
   0x1   :  { %v11_v0 = vld [vmem:[%s159_s0] sm:$0xff]  ;;  %v117_v1 = vld [vmem:[%s159_s0 + $0x8] sm:$0xff]  ;;  %v118_v2 = vld [vmem:[%s159_s0 + $0x10] sm:$0xff] }
   0x2   :  { %v18_v3 = vld [vmem:[%s160_s1] sm:$0xff]  ;;  %v119_v4 = vld [vmem:[%s160_s1 + $0x8] sm:$0xff]  ;;  %v120_v5 = vld [vmem:[%s160_s1 + $0x10] sm:$0xff] }
   0x3   :  { %v19_v6 = vsub.f32 %v11_v0, %v18_v3  ;;  %v26_v7 = vsub.f32 %v117_v1, %v18_v3  ;;  %v33_v8 = vsub.f32 %v118_v2, %v18_v3  ;;  %v42_v9 = vsub.f32 %v11_v0, %v119_v4 }
   0x4   :  { %v49_v10 = vsub.f32 %v117_v1, %v119_v4  ;;  %v56_v11 = vsub.f32 %v118_v2, %v119_v4  ;;  %v74_v12 = vsub.f32 %v11_v0, %v120_v5  ;;  %v81_v13 = vsub.f32 %v117_v1, %v120_v5 }
   0x5   :  { %v20_v14 = vmul.f32 0.31830987, %v19_v6  ;;  %v27_v15 = vmul.f32 0.31830987, %v26_v7  ;;  %v34_v16 = vmul.f32 0.31830987, %v33_v8  ;;  %v88_v20 = vsub.f32 %v118_v2, %v120_v5 }
   0x6   :  { %v43_v17 = vmul.f32 0.31830987, %v42_v9  ;;  %v50_v18 = vmul.f32 0.31830987, %v49_v10  ;;  %v57_v19 = vmul.f32 0.31830987, %v56_v11 }
   0x7   :  { %v21_v21 = vadd.f32 0.5, %v20_v14  ;;  %v28_v22 = vadd.f32 0.5, %v27_v15  ;;  %v35_v23 = vadd.f32 0.5, %v34_v16  ;;  %v75_v24 = vmul.f32 0.31830987, %v74_v12 }
   0x8   :  { %v44_v25 = vadd.f32 0.5, %v43_v17  ;;  %v51_v26 = vadd.f32 0.5, %v50_v18  ;;  %v58_v27 = vadd.f32 0.5, %v57_v19  ;;  %v82_v28 = vmul.f32 0.31830987, %v81_v13 }
   0x9   :  { %v22_v29 = vfloor.f32 %v21_v21  ;;  %v29_v30 = vfloor.f32 %v28_v22  ;;  %v36_v31 = vfloor.f32 %v35_v23  ;;  %v76_v32 = vadd.f32 0.5, %v75_v24 }
   0xa   :  { %v45_v33 = vfloor.f32 %v44_v25  ;;  %v52_v34 = vfloor.f32 %v51_v26  ;;  %v59_v35 = vfloor.f32 %v58_v27  ;;  %v83_v36 = vadd.f32 0.5, %v82_v28 }
   0xb   :  { %v23_v37 = vmul.f32 3.1415927, %v22_v29  ;;  %v30_v38 = vmul.f32 3.1415927, %v29_v30  ;;  %v37_v39 = vmul.f32 3.1415927, %v36_v31  ;;  %v77_v40 = vfloor.f32 %v76_v32 }
   0xc   :  { %v46_v41 = vmul.f32 3.1415927, %v45_v33  ;;  %v53_v42 = vmul.f32 3.1415927, %v52_v34  ;;  %v60_v43 = vmul.f32 3.1415927, %v59_v35  ;;  %v84_v44 = vfloor.f32 %v83_v36 }
   0xd   :  { %v24_v45 = vsub.f32 %v19_v6, %v23_v37  ;;  %v31_v46 = vsub.f32 %v26_v7, %v30_v38  ;;  %v38_v47 = vsub.f32 %v33_v8, %v37_v39  ;;  %v78_v48 = vmul.f32 3.1415927, %v77_v40 }
   0xe   :  { %v47_v49 = vsub.f32 %v42_v9, %v46_v41  ;;  %v54_v50 = vsub.f32 %v49_v10, %v53_v42  ;;  %v61_v51 = vsub.f32 %v56_v11, %v60_v43  ;;  %v85_v52 = vmul.f32 3.1415927, %v84_v44 }
   0xf   :  { %v25_v53 = vmul.f32 %v24_v45, %v24_v45  ;;  %v32_v54 = vmul.f32 %v31_v46, %v31_v46  ;;  %v39_v55 = vmul.f32 %v38_v47, %v38_v47  ;;  %v79_v56 = vsub.f32 %v74_v12, %v78_v48 }
  0x10   :  { %v48_v57 = vmul.f32 %v47_v49, %v47_v49  ;;  %v55_v58 = vmul.f32 %v54_v50, %v54_v50  ;;  %v62_v59 = vmul.f32 %v61_v51, %v61_v51  ;;  %v86_v60 = vsub.f32 %v81_v13, %v85_v52 }
  0x11   :  { %v89_v61 = vmul.f32 0.31830987, %v88_v20  ;;  %v80_v0 = vmul.f32 %v79_v56, %v79_v56 }
  0x12   :  { %v66_v62 = vadd.f32 %v48_v57, %v39_v55  ;;  %v67_v63 = vadd.f32 %v62_v59, %v25_v53  ;;  %v69_v1 = vadd.f32 %v55_v58, %v39_v55  ;;  %v70_v2 = vadd.f32 %v62_v59, %v32_v54 }
  0x13   :  { %v87_v3 = vmul.f32 %v86_v60, %v86_v60  ;;  %v90_v4 = vadd.f32 0.5, %v89_v61  ;;  %v63_v6 = vadd.f32 %v48_v57, %v32_v54  ;;  %v64_v7 = vadd.f32 %v55_v58, %v25_v53 }
  0x14   :  { %v68_v5 = vmin.f32 %v66_v62, %v67_v63  ;;  %v71_v8 = vmin.f32 %v69_v1, %v70_v2 }
  0x15   :  { %v91_v9 = vfloor.f32 %v90_v4  ;;  %v65_v14 = vmin.f32 %v63_v6, %v64_v7 }
  0x16   :  { %v95_v11 = vadd.f32 %v80_v0, %v71_v8  ;;  %v96_v12 = vadd.f32 %v87_v3, %v68_v5 }
  0x17   :  { %v92_v10 = vmul.f32 3.1415927, %v91_v9 }
  0x18   :  { %v98_v13 = vmin.f32 %v95_v11, %v96_v12 }
  0x19   :  { %v93_v15 = vsub.f32 %v88_v20, %v92_v10 }
  0x1b   :  { %v94_v16 = vmul.f32 %v93_v15, %v93_v15 }
  0x1d   :  { %v97_v17 = vadd.f32 %v94_v16, %v65_v14 }
  0x1f   :  { %v99_v18 = vmin.f32 %v98_v13, %v97_v17 }
  0x21   :  { %121 = vrsqrt.f32 %v99_v18  ;;  %vm102_vm0 = vcmp.eq.f32.partialorder %v99_v18, inf  ;;  %v105_v21 = vand.u32 2147483648, %v99_v18  ;;  %vm104_vm1 = vcmp.eq.f32.partialorder %v99_v18, 0.0 }
  0x2b   :  { %v122_v19 = vpop.eup %121 }
  0x2c   :  { %v101_v22 = vmul.f32 %v122_v19, %v99_v18 }
  0x2e   :  { %v103_v23 = vsel %vm102_vm0, %v99_v18, %v101_v22 }
  0x2f   :  { %v106_v24 = vsel %vm104_vm1, %v105_v21, %v103_v23 }
  0x30   :  { %108 = vst [vmem:[%s161_s2] sm:$0xff] %v106_v24 }

</bundles_post_ra>
